<compile_context>
chip_gen: v5e
topology: v5e:2x2
jax: 0.10.0
libtpu: 0.0.40
codegen_flags: <defaults>
</compile_context>

<pallas_src>
import jax
import jax.numpy as jnp
from jax.experimental import pallas as pl
from jax.experimental.pallas import tpu as pltpu

N_ACTIONS = 16
NODE_NUM = 10
N_STATES = 7 + NODE_NUM * 4          # 47
IN_DIM = N_STATES + 1                # 48
HIDDEN = 64

# Lane-dense padded sizes (multiples of 128 on the lane axis) -- VMEM only.
HIDDEN_PAD = 128
OUT_PAD = 128


def _round_up(n, m):
    return ((n + m - 1) // m) * m


def _net_kernel(x_ref, w1_ref, b1_ref, w2_ref, b2_ref, out_ref):
    # x_ref:  (TILE_B, IN_DIM)        f32 (cast to compute dtype in-kernel)
    # w1_ref: (IN_DIM, HIDDEN_PAD)    b1_ref: (1, HIDDEN_PAD)  f32
    # w2_ref: (HIDDEN_PAD, OUT_PAD)   b2_ref: (1, OUT_PAD)     f32
    # out_ref: (TILE_B, N_ACTIONS)
    x = x_ref[...].astype(w1_ref.dtype)                        # cast under DMA
    h = jnp.dot(x, w1_ref[...], preferred_element_type=jnp.float32) + b1_ref[...]
    h = jnp.maximum(h, 0.0)                                    # ReLU in f32 (VPU)
    y = jnp.dot(h.astype(w2_ref.dtype), w2_ref[...],
                preferred_element_type=jnp.float32) + b2_ref[...]
    # Store only the real 16 action columns; the padded columns never touch HBM.
    out_ref[...] = y[:, :N_ACTIONS].astype(out_ref.dtype)


def prepare_params(w1, b1, w2, b2, *, use_bf16=True):
    """Pad/cast weights once (hoisted out of the per-call forward).

    w1: (IN_DIM, HIDDEN), b1: (HIDDEN,), w2: (HIDDEN, N_ACTIONS), b2: (N_ACTIONS,)
    Extra hidden units see zero weights/bias -> relu(0)=0; extra output
    columns read zero w2 columns, so the math is unchanged.
    """
    cdt = jnp.bfloat16 if use_bf16 else jnp.float32
    w1_p = (jnp.zeros((IN_DIM, HIDDEN_PAD), jnp.float32)
            .at[:, :HIDDEN].set(w1)).astype(cdt)
    b1_p = jnp.zeros((1, HIDDEN_PAD), jnp.float32).at[0, :HIDDEN].set(b1)
    w2_p = (jnp.zeros((HIDDEN_PAD, OUT_PAD), jnp.float32)
            .at[:HIDDEN, :N_ACTIONS].set(w2)).astype(cdt)
    b2_p = jnp.zeros((1, OUT_PAD), jnp.float32).at[0, :N_ACTIONS].set(b2)
    return w1_p, b1_p, w2_p, b2_p


def net_forward(x, params, *, tile_b=4096, out_dtype=jnp.float32):
    """Fused fc1 -> ReLU -> out forward pass.

    x:      (B, IN_DIM) float32
    params: output of prepare_params()
    returns (B, N_ACTIONS) in out_dtype (default float32)
    """
    w1_p, b1_p, w2_p, b2_p = params
    B = x.shape[0]

    # Batch tiling: single sublane-aligned tile for small B, otherwise large
    # tiles (>= 2 grid steps for B > tile_b, so both v7x TensorCores engage).
    if B <= tile_b:
        tile_b = max(16, _round_up(B, 16))
    num_tiles = pl.cdiv(B, tile_b)

    return pl.pallas_call(
        _net_kernel,
        out_shape=jax.ShapeDtypeStruct((B, N_ACTIONS), out_dtype),
        grid=(num_tiles,),
        in_specs=[
            pl.BlockSpec((tile_b, IN_DIM), lambda i: (i, 0)),      # x: batch-tiled
            pl.BlockSpec((IN_DIM, HIDDEN_PAD), lambda i: (0, 0)),  # weights resident
            pl.BlockSpec((1, HIDDEN_PAD), lambda i: (0, 0)),
            pl.BlockSpec((HIDDEN_PAD, OUT_PAD), lambda i: (0, 0)),
            pl.BlockSpec((1, OUT_PAD), lambda i: (0, 0)),
        ],
        out_specs=pl.BlockSpec((tile_b, N_ACTIONS), lambda i: (i, 0)),
        compiler_params=pltpu.CompilerParams(
            dimension_semantics=("parallel",),
            vmem_limit_bytes=32 * 1024 * 1024,   # covers big tiles on v5e too
        ),
    )(x, w1_p, b1_p, w2_p, b2_p)


def init_params():
    # Mirror nn.init.constant_(weight, 1), nn.init.constant_(bias, 0).
    w1 = jnp.ones((IN_DIM, HIDDEN), dtype=jnp.float32)
    b1 = jnp.zeros((HIDDEN,), dtype=jnp.float32)
    w2 = jnp.ones((HIDDEN, N_ACTIONS), dtype=jnp.float32)
    b2 = jnp.zeros((N_ACTIONS,), dtype=jnp.float32)
    return w1, b1, w2, b2


def _ref_forward(x, w1, b1, w2, b2, use_bf16):
    """Pure-JAX reference matching the kernel's precision path."""
    cdt = jnp.bfloat16 if use_bf16 else jnp.float32
    xq = x.astype(cdt).astype(jnp.float32)
    w1q = w1.astype(cdt).astype(jnp.float32)
    w2q = w2.astype(cdt).astype(jnp.float32)
    h = jnp.maximum(xq @ w1q + b1, 0.0)
    hq = h.astype(cdt).astype(jnp.float32)
    return hq @ w2q + b2


if __name__ == "__main__":
    key = jax.random.PRNGKey(0)
    w1, b1, w2, b2 = init_params()
    params_bf16 = prepare_params(w1, b1, w2, b2, use_bf16=True)
    params_f32 = prepare_params(w1, b1, w2, b2, use_bf16=False)

    # --- small-batch check (bf16 MXU path, default) ---
    B = 2
    x = jax.random.normal(key, (B, IN_DIM), dtype=jnp.float32)
    out = jax.block_until_ready(net_forward(x, params_bf16))
    ref = _ref_forward(x, w1, b1, w2, b2, use_bf16=True)
    assert out.shape == (B, N_ACTIONS)
    assert jnp.allclose(out, ref, atol=1e-2, rtol=1e-2), "bf16 mismatch vs reference"

    # --- exact f32 semantics check (matches PyTorch forward math) ---
    out_f32 = jax.block_until_ready(net_forward(x, params_f32))
    ref_f32 = jnp.maximum(x @ w1 + b1, 0.0) @ w2 + b2
    assert jnp.allclose(out_f32, ref_f32, atol=1e-4, rtol=1e-4), "f32 mismatch"

    # --- ragged-batch tiling check (B not a multiple of tile_b, >1 grid step) ---
    B2 = 300
    x2 = jax.random.normal(jax.random.PRNGKey(1), (B2, IN_DIM), dtype=jnp.float32)
    out2 = jax.block_until_ready(net_forward(x2, params_bf16, tile_b=128))
    ref2 = _ref_forward(x2, w1, b1, w2, b2, use_bf16=True)
    assert out2.shape == (B2, N_ACTIONS)
    assert jnp.allclose(out2, ref2, atol=1e-2, rtol=1e-2), "tiled mismatch"

    print("KERNEL_OK")
</pallas_src>

<mosaic_0001>
module attributes {stable_mosaic.version = 11 : i64} {
  func.func @_net_kernel(%arg0: i32, %arg1: memref<16x48xf32, #tpu.memory_space<vmem>>, %arg2: memref<48x128xbf16, #tpu.memory_space<vmem>>, %arg3: memref<1x128xf32, #tpu.memory_space<vmem>>, %arg4: memref<128x128xbf16, #tpu.memory_space<vmem>>, %arg5: memref<1x128xf32, #tpu.memory_space<vmem>>, %arg6: memref<16x16xf32, #tpu.memory_space<vmem>>) attributes {dimension_semantics = [#tpu.dimension_semantics<parallel>], iteration_bounds = array<i64: 1>, scalar_prefetch = 0 : i64, scratch_operands = 0 : i64, tpu.core_type = #tpu.core_type<tc>, window_params = [{transform_indices = @transform_0, window_bounds = array<i64: 16, 48>}, {pipeline_mode = #tpu.pipeline_mode<synchronous>, transform_indices = @transform_1, window_bounds = array<i64: 48, 128>}, {pipeline_mode = #tpu.pipeline_mode<synchronous>, transform_indices = @transform_2, window_bounds = array<i64: 1, 128>}, {pipeline_mode = #tpu.pipeline_mode<synchronous>, transform_indices = @transform_3, window_bounds = array<i64: 128, 128>}, {pipeline_mode = #tpu.pipeline_mode<synchronous>, transform_indices = @transform_4, window_bounds = array<i64: 1, 128>}, {transform_indices = @transform_5, window_bounds = array<i64: 16, 16>}]} {
    %c0 = arith.constant 0 : index
    %c0_0 = arith.constant 0 : index
    %0 = vector.load %arg1[%c0, %c0_0] : memref<16x48xf32, #tpu.memory_space<vmem>>, vector<16x48xf32>
    %1 = arith.truncf %0 : vector<16x48xf32> to vector<16x48xbf16>
    %c0_1 = arith.constant 0 : index
    %c0_2 = arith.constant 0 : index
    %2 = vector.load %arg2[%c0_1, %c0_2] : memref<48x128xbf16, #tpu.memory_space<vmem>>, vector<48x128xbf16>
    %cst = arith.constant dense<0.000000e+00> : vector<16x128xf32>
    %3 = tpu.matmul %1, %2, %cst {dimension_numbers = #tpu.dot_dimension_numbers<[1], [0], [0], [1], [0, 0, 1, 1], [], []>} : vector<16x48xbf16>, vector<48x128xbf16>, vector<16x128xf32> -> vector<16x128xf32>
    %c0_3 = arith.constant 0 : index
    %c0_4 = arith.constant 0 : index
    %4 = vector.load %arg3[%c0_3, %c0_4] : memref<1x128xf32, #tpu.memory_space<vmem>>, vector<1x128xf32>
    %5 = vector.broadcast %4 : vector<1x128xf32> to vector<16x128xf32>
    %6 = arith.addf %3, %5 : vector<16x128xf32>
    %cst_5 = arith.constant 0.000000e+00 : f32
    %7 = vector.broadcast %cst_5 : f32 to vector<16x128xf32>
    %8 = arith.maximumf %6, %7 : vector<16x128xf32>
    %9 = arith.truncf %8 : vector<16x128xf32> to vector<16x128xbf16>
    %c0_6 = arith.constant 0 : index
    %c0_7 = arith.constant 0 : index
    %10 = vector.load %arg4[%c0_6, %c0_7] : memref<128x128xbf16, #tpu.memory_space<vmem>>, vector<128x128xbf16>
    %cst_8 = arith.constant dense<0.000000e+00> : vector<16x128xf32>
    %11 = tpu.matmul %9, %10, %cst_8 {dimension_numbers = #tpu.dot_dimension_numbers<[1], [0], [0], [1], [0, 0, 1, 1], [], []>} : vector<16x128xbf16>, vector<128x128xbf16>, vector<16x128xf32> -> vector<16x128xf32>
    %c0_9 = arith.constant 0 : index
    %c0_10 = arith.constant 0 : index
    %12 = vector.load %arg5[%c0_9, %c0_10] : memref<1x128xf32, #tpu.memory_space<vmem>>, vector<1x128xf32>
    %13 = vector.broadcast %12 : vector<1x128xf32> to vector<16x128xf32>
    %14 = arith.addf %11, %13 : vector<16x128xf32>
    %15 = vector.extract_strided_slice %14 {offsets = [0, 0], sizes = [16, 16], strides = [1, 1]} : vector<16x128xf32> to vector<16x16xf32>
    %c0_11 = arith.constant 0 : index
    %c0_12 = arith.constant 0 : index
    %16 = vector.load %arg6[%c0_11, %c0_12] : memref<16x16xf32, #tpu.memory_space<vmem>>, vector<16x16xf32>
    tpu.vector_store %arg6[%c0_11, %c0_12], %15 {strides = array<i32>} : memref<16x16xf32, #tpu.memory_space<vmem>>, vector<16x16xf32>,
    return
  }
  func.func @transform_0(%arg0: i32) -> (i32, i32) {
    %c0_i32 = arith.constant 0 : i32
    %c0_i32_0 = arith.constant 0 : i32
    return %arg0, %c0_i32 : i32, i32
  }
  func.func @transform_1(%arg0: i32) -> (i32, i32) {
    %c0_i32 = arith.constant 0 : i32
    %c0_i32_0 = arith.constant 0 : i32
    %c0_i32_1 = arith.constant 0 : i32
    return %c0_i32, %c0_i32_0 : i32, i32
  }
  func.func @transform_2(%arg0: i32) -> (i32, i32) {
    %c0_i32 = arith.constant 0 : i32
    %c0_i32_0 = arith.constant 0 : i32
    %c0_i32_1 = arith.constant 0 : i32
    return %c0_i32, %c0_i32_0 : i32, i32
  }
  func.func @transform_3(%arg0: i32) -> (i32, i32) {
    %c0_i32 = arith.constant 0 : i32
    %c0_i32_0 = arith.constant 0 : i32
    %c0_i32_1 = arith.constant 0 : i32
    return %c0_i32, %c0_i32_0 : i32, i32
  }
  func.func @transform_4(%arg0: i32) -> (i32, i32) {
    %c0_i32 = arith.constant 0 : i32
    %c0_i32_0 = arith.constant 0 : i32
    %c0_i32_1 = arith.constant 0 : i32
    return %c0_i32, %c0_i32_0 : i32, i32
  }
  func.func @transform_5(%arg0: i32) -> (i32, i32) {
    %c0_i32 = arith.constant 0 : i32
    %c0_i32_0 = arith.constant 0 : i32
    return %arg0, %c0_i32 : i32, i32
  }
}

</mosaic_0001>

<bundles_post_ra>
// kernel: tpu_custom_call.1
= control target key start
LH: loop header
LB: loop body
LE: loop exit
PB: predicated region body
PF: predicated region fallthrough
CT: control target
= control target key end

     0   :  { %10 = vsyncpa [#allocation3], 0  ;;  %s456_s0 = inlined_call_operand.hbm [shape: f32[2,48], index: 0, kind: input, shape index: {}]   ;;  %s457_s1 = inlined_call_operand.hbm [shape: bf16[48,128], index: 1, kind: input, shape index: {}]   ;;  %s458_s2 = inlined_call_operand.vmem [shape: f32[1,128], index: 2, kind: input, shape index: {}]   ;;  %s459_s3 = inlined_call_operand.hbm [shape: bf16[128,128], index: 3, kind: input, shape index: {}]   ;;  %s460_s4 = inlined_call_operand.vmem [shape: f32[1,128], index: 4, kind: input, shape index: {}]   ;;  %s461_s5 = inlined_call_operand.hbm [shape: f32[2,16], index: 5, kind: output, shape index: {}]  }
   0x1   :  { %11 = vsyncpa [#allocation6], 0 }
   0x2   :  { %12 = vsyncpa [#allocation4], 0  ;;  %s30_s20 = sshll.u32 %s457_s1, 4  ;;  %s31_s20 = int_to_ptr.hbm [resolvable:$true] %s30_s20 }
   0x3   :  { %16 = vsyncadd [#allocation3], 224  ;;  %s394_s21 = smov [#allocation5]   ;;  %s17_s25 = sshll.u32 %s456_s0, 4  ;;  %s18_s25 = int_to_ptr.hbm [resolvable:$true] %s17_s25 }
   0x4   :  { %s32_s22 = sshll.u32 %s394_s21, 4  ;;  %s395_s26 = smov 64   ;;  %s33_s22 = int_to_ptr.vmem [resolvable:$true] %s32_s22 }
   0x5   :  { %s396_s27 = smov 4   ;;  %s397_s28 = smov [#allocation2]  }
   0x6   :  { %38 = dma.hbm_to_vmem [thread:$0]  %s31_s20, 384, %s33_s22, [#allocation6], %s395_s26, %s395_s26, %s396_s27  }
   0x7   :  { %s19_s29 = sshll.u32 %s397_s28, 4  ;;  %s398_s30 = smov 32   ;;  %s20_s29 = int_to_ptr.vmem [resolvable:$true] %s19_s29 }
   0x8   :  { %s399_s6 = smov 2   ;;  %s45_s8 = sshll.u32 %s459_s3, 4  ;;  %s46_s8 = int_to_ptr.hbm [resolvable:$true] %s45_s8 }
   0x9   :  { %25 = dma.hbm_to_vmem [thread:$0]  %s18_s25, 32, %s20_s29, [#allocation3], %s398_s30, %s398_s30, %s399_s6  }
   0xa   :  { %s400_s9 = smov [#allocation7]  }
   0xb   :  { %s47_s0 = sshll.u32 %s400_s9, 4  ;;  %s48_s0 = int_to_ptr.vmem [resolvable:$true] %s47_s0 }
   0xc   :  { %53 = dma.hbm_to_vmem [thread:$0]  %s46_s8, 1024, %s48_s0, [#allocation6], %s395_s26, %s395_s26, %s396_s27  }
   0xd   :  { %388 = dma.done.wait [#allocation3], 256  }
   0xe   :  { %389 = vsyncadd [#allocation3], 4294967040 }
   0xf   :  { %390 = dma.done.wait [#allocation6], 1408  }
  0x10   :  { %391 = vsyncadd [#allocation6], 4294965888  ;;  %v273_v0 = vld [vmem:[#allocation5 + $0x10] sm:$0xff]  ;;  %v272_v2 = vld [vmem:[#allocation5 + $0x8] sm:$0xff]  ;;  %vm100_vm0 = vcmask 392192   ;;  %vm203_vm1 = vcmask 130048  }
  0x11   :  { %v281_v1 = vld [vmem:[#allocation7 + $0x38] sm:$0xff]  ;;  %109 = vmatpush.bf16.msra.mxu0 %v273_v0  ;;  %v280_v3 = vld [vmem:[#allocation7 + $0x30] sm:$0xff]  ;;  %v271_v4 = vld [vmem:[#allocation5] sm:$0xff] }
  0x12   :  { %189 = vmatpush.bf16.msra.mxu1 %v281_v1  ;;  %v69_v5 = vld [vmem:[#allocation2] sm:$0xff]  ;;  %v70_v6 = vld [vmem:[#allocation2 + $0x8] sm:$0xff]  ;;  %v279_v7 = vld [vmem:[#allocation7 + $0x28] sm:$0xff] }
  0x13   :  { %v71_v8 = vpack.c.bf16 %v70_v6, %v69_v5  ;;  %v278_v9 = vld [vmem:[#allocation7 + $0x20] sm:$0xff]  ;;  %v277_v10 = vld [vmem:[#allocation7 + $0x18] sm:$0xff]  ;;  %v276_v11 = vld [vmem:[#allocation7 + $0x10] sm:$0xff] }
  0x14   :  { %v275_v12 = vld [vmem:[#allocation7 + $0x8] sm:$0xff]  ;;  %v274_v13 = vld [vmem:[#allocation7] sm:$0xff]  ;;  %v290_v15 = vld [vmem:[%s458_s2] ss:$0 sm:$0xff] }
  0x15   :  { %110 = vmatpush.bf16.msra.mxu0 %v272_v2  ;;  %v291_v22 = vld [vmem:[%s460_s4] ss:$0 sm:$0xff] }
  0x16   :  { %190 = vmatpush.bf16.msra.mxu1 %v280_v3 }
  0x19   :  { %111 = vmatpush.bf16.msra.mxu0 %v271_v4 }
  0x1a   :  { %191 = vmatpush.bf16.msra.mxu1 %v279_v7 }
  0x1c   :  { %238 = vmatmul.msk.bf16.vlgmr.msra.gmra.mxu0 %vm100_vm0, %v71_v8 }
  0x1e   :  { %192 = vmatpush.bf16.msra.mxu1 %v278_v9 }
  0x22   :  { %193 = vmatpush.bf16.msra.mxu1 %v277_v10 }
  0x26   :  { %194 = vmatpush.bf16.msra.mxu1 %v276_v11 }
  0x2a   :  { %195 = vmatpush.bf16.msra.mxu1 %v275_v12 }
  0x2e   :  { %196 = vmatpush.bf16.msra.mxu1 %v274_v13 }
  0x99   :  { %v113_v14 = vpop.f32.mrf.mxu0 }
  0x9a   :  { %v114_v16 = vadd.f32 %v290_v15, %v113_v14 }
  0x9c   :  { %v118_v19 = vmax.f32 %v114_v16, 0.0 }
  0xa1   :  { %v115_v17 = vpop.f32.mrf.mxu0 }
  0xa2   :  { %v116_v18 = vadd.f32 %v290_v15, %v115_v17 }
  0xa4   :  { %v119_v20 = vmax.f32 %v116_v18, 0.0 }
  0xa6   :  { %v120_v21 = vpack.c.bf16 %v119_v20, %v118_v19 }
  0xa8   :  { %197 = vmatmul.bf16.vlgmr.msra.gmra.mxu1 %v120_v21 }
 0x125   :  { %v198_v23 = vpop.f32.mrf.mxu1 }
 0x126   :  { %v199_v24 = vadd.f32 %v291_v22, %v198_v23 }
 0x128   :  { %204 = vst.msk [vmem:[#allocation8] sm:$0xff] %vm203_vm1, %v199_v24 }
 0x12d   :  { %v200_v25 = vpop.f32.mrf.mxu1 }
 0x12e   :  { %v201_v26 = vadd.f32 %v291_v22, %v200_v25 }
 0x130   :  { %205 = vst.msk [vmem:[#allocation8 + $0x8] sm:$0xff] %vm203_vm1, %v201_v26 }
 0x131   :  { %209 = vsyncadd [#allocation4], 224  ;;  %s212_s14 = sshll.u32 %s461_s5, 4  ;;  %s401_s15 = smov [#allocation8]   ;;  %s213_s14 = int_to_ptr.hbm [resolvable:$true] %s212_s14 }
 0x132   :  { %s210_s16 = sshll.u32 %s401_s15, 4  ;;  %s211_s16 = int_to_ptr.vmem [resolvable:$true] %s210_s16 }
 0x133   :  { %218 = dma.vmem_to_hbm [thread:$0]  %s211_s16, 32, %s213_s14, [#allocation4], %s398_s30, %s398_s30, %s399_s6  }
 0x134   :  { %392 = dma.done.wait [#allocation4], 256  }
 0x135   :  { %393 = vsyncadd [#allocation4], 4294967040 }
 0x136   :  { %223 = vsyncpa [#allocation3], 1 }
 0x137   :  { %224 = vsyncpa [#allocation6], 1 }
 0x138   :  { %225 = vsyncpa [#allocation4], 1 }

</bundles_post_ra>
